<compile_context>
chip_gen: v5e
topology: v5e:2x2
jax: 0.10.0
libtpu: 0.0.40
codegen_flags: <defaults>
</compile_context>

<pallas_src>
import jax
import jax.numpy as jnp
from jax.experimental import pallas as pl
from jax.experimental.pallas import tpu as pltpu

_MIB = 1024 * 1024


def _round_up(x, m):
    return ((x + m - 1) // m) * m


def _vmem_capacity_bytes():
    try:
        return int(pltpu.get_tpu_info().vmem_capacity_bytes)
    except Exception:
        return 128 * _MIB   # v5e / v6e default


def _ffn_kernel(x_ref, w1_ref, b1_ref, w2_ref, b2_ref, g_ref, beta_ref,
                o_ref, acc_ref):
    j = pl.program_id(1)
    nj = pl.num_programs(1)

    @pl.when(j == 0)
    def _():
        acc_ref[...] = jnp.zeros_like(acc_ref)

    x_in = x_ref[...]                                         # (tm, din)
    x_bf = x_in if x_in.dtype == jnp.bfloat16 else x_in.astype(jnp.bfloat16)

    # fc1 (pointwise conv) on this dout tile: x @ W1[:, jt] + b1[jt], ReLU.
    # ReLU is elementwise over h columns, so per-tile application is exact.
    h = jnp.dot(x_bf, w1_ref[...], preferred_element_type=jnp.float32)
    h = jnp.maximum(h + b1_ref[...], 0.0)                     # (tm, tn), f32

    # fc2 partial product for this dout tile, accumulated in f32.
    acc_ref[...] += jnp.dot(h.astype(jnp.bfloat16), w2_ref[...],
                            preferred_element_type=jnp.float32)

    @pl.when(j == nj - 1)
    def _():
        xf = x_ref[...].astype(jnp.float32)
        # dropout == identity (eval mode); residual add
        z = acc_ref[...] + b2_ref[...] + xf
        # LayerNorm over din (biased variance, eps=1e-5: PyTorch default)
        mean = jnp.mean(z, axis=-1, keepdims=True)
        zc = z - mean
        var = jnp.mean(zc * zc, axis=-1, keepdims=True)
        inv = jax.lax.rsqrt(var + 1e-5)
        o_ref[...] = (zc * inv * g_ref[...] + beta_ref[...]).astype(o_ref.dtype)


def _fits(tm, tn, *, din, dout, x_bytes, out_bytes, budget):
    """Conservative live-set estimate for one grid step."""
    w_bufs = 1 if tn >= dout else 2            # single-buffer resident weights
    resident = 3 * din * 4                     # b2, gamma, beta (f32)
    weights = w_bufs * (2 * din * tn * 2 + tn * 4)   # W1+W2 tiles (bf16) + b1
    streamed = 2 * tm * din * x_bytes + 2 * tm * din * out_bytes  # x, out
    scratch = tm * din * 4                     # f32 accumulator
    # in-kernel temporaries: bf16 x copy, f32 x upcast, z, zc, f32 h, bf16 h
    temps = tm * din * 14 + tm * tn * 6
    return resident + weights + streamed + scratch + temps <= budget


def _tm_candidates(M):
    m8 = _round_up(M, 8)
    cands = [min(512, m8)]
    for t in (512, 256, 128, 64, 32, 16, 8):   # MXU-aligned first
        if t <= m8 and t not in cands:
            cands.append(t)
    return cands


def _tn_candidates(dout):
    cands = [dout]                             # full width (single j step)
    dp = _round_up(dout, 128)
    for t in (4096, 2048, 1024, 512, 256, 128):
        if t < dp:
            cands.append(t)
    return cands


def positionwise_ffn(x, w1, b1, w2, b2, gamma, beta, *,
                     input_in_bf16=False, vmem_budget_bytes=None):
    """x: (B, L, din); w1: (din, dout); w2: (dout, din); vectors are 1D."""
    B, L, din = x.shape
    dout = w1.shape[1]
    M = B * L
    out_dtype = x.dtype
    out_bytes = jnp.dtype(out_dtype).itemsize
    x_bytes = 2 if input_in_bf16 else jnp.dtype(x.dtype).itemsize

    # ---- generation-aware VMEM limit / budget ---------------------------
    cap = _vmem_capacity_bytes()
    if cap <= 64 * _MIB:                       # v7x-class: 64 MiB / TensorCore
        vmem_limit = max(24 * _MIB, min(52 * _MIB, cap - 8 * _MIB))
        budget = 38 * _MIB
    else:                                      # v5e / v6e: 128 MiB
        vmem_limit = max(24 * _MIB, min(104 * _MIB, cap - 16 * _MIB))
        budget = 92 * _MIB
    if vmem_budget_bytes is not None:
        budget = min(vmem_budget_bytes, vmem_limit)

    # ---- choose (tm, tn): MXU-aligned row tile, streamed dout tile -------
    tm = tn = None
    for t_m in _tm_candidates(M):
        for t_n in _tn_candidates(dout):
            if _fits(t_m, t_n, din=din, dout=dout, x_bytes=x_bytes,
                     out_bytes=out_bytes, budget=budget):
                tm, tn = t_m, t_n
                break
        if tm is not None:
            break
    if tm is None:                             # last resort (tiny budget)
        tm, tn = _tm_candidates(M)[-1], min(dout, 128)

    # v7x megacore: make sure the "parallel" row axis has >= 2 steps.
    if _round_up(M, tm) // tm < 2 and tm >= 16:
        tm = max(8, (tm // 2 // 8) * 8)

    M_pad = _round_up(M, tm)
    dout_pad = _round_up(dout, tn) if tn < dout else dout
    nj = dout_pad // tn
    n_row_tiles = M_pad // tm

    # ---- prepare operands ------------------------------------------------
    x2 = x.reshape(M, din)
    if input_in_bf16:
        x2 = x2.astype(jnp.bfloat16)
    if M_pad != M:
        x2 = jnp.pad(x2, ((0, M_pad - M), (0, 0)))

    # Weights as bf16 MXU operands (no-op if already pre-cast upstream).
    w1b = w1 if w1.dtype == jnp.bfloat16 else w1.astype(jnp.bfloat16)
    w2b = w2 if w2.dtype == jnp.bfloat16 else w2.astype(jnp.bfloat16)
    b1r = b1.reshape(1, dout).astype(jnp.float32)
    if dout_pad != dout:
        # Zero-padded dout columns/rows contribute exactly 0 to the output.
        w1b = jnp.pad(w1b, ((0, 0), (0, dout_pad - dout)))
        w2b = jnp.pad(w2b, ((0, dout_pad - dout), (0, 0)))
        b1r = jnp.pad(b1r, ((0, 0), (0, dout_pad - dout)))
    b2r = b2.reshape(1, din).astype(jnp.float32)
    gr = gamma.reshape(1, din).astype(jnp.float32)
    br = beta.reshape(1, din).astype(jnp.float32)

    # Single-buffer grid-invariant operands; double-buffer streamed tiles.
    const = dict(pipeline_mode=pl.Buffered(1))
    w_const = const if nj == 1 else {}

    cost = pl.CostEstimate(
        flops=4 * M_pad * din * dout_pad,        # two matmuls, 2*M*din*dout each
        transcendentals=M_pad,                   # one rsqrt per row
        bytes_accessed=(M_pad * din * x_bytes                      # x in
                        + M_pad * din * out_bytes                  # out
                        + n_row_tiles * (2 * din * dout_pad * 2    # streamed W1/W2
                                         + dout_pad * 4)           # b1
                        + 3 * din * 4),                            # b2 / LN params
    )

    out = pl.pallas_call(
        _ffn_kernel,
        out_shape=jax.ShapeDtypeStruct((M_pad, din), out_dtype),
        grid_spec=pltpu.PrefetchScalarGridSpec(
            num_scalar_prefetch=0,
            grid=(n_row_tiles, nj),
            in_specs=[
                pl.BlockSpec((tm, din), lambda i, j: (i, 0)),              # x tile
                pl.BlockSpec((din, tn), lambda i, j: (0, j), **w_const),   # W1 tile
                pl.BlockSpec((1, tn), lambda i, j: (0, j), **w_const),     # b1 tile
                pl.BlockSpec((tn, din), lambda i, j: (j, 0), **w_const),   # W2 tile
                pl.BlockSpec((1, din), lambda i, j: (0, 0), **const),      # b2
                pl.BlockSpec((1, din), lambda i, j: (0, 0), **const),      # gamma
                pl.BlockSpec((1, din), lambda i, j: (0, 0), **const),      # beta
            ],
            out_specs=pl.BlockSpec((tm, din), lambda i, j: (i, 0)),
            scratch_shapes=[pltpu.VMEM((tm, din), jnp.float32)],           # fc2 acc
        ),
        compiler_params=pltpu.CompilerParams(
            dimension_semantics=("parallel", "arbitrary"),
            vmem_limit_bytes=vmem_limit,
        ),
        cost_estimate=cost,
    )(x2, w1b, b1r, w2b, b2r, gr, br)

    return out[:M].reshape(B, L, din)


def reference_ffn_f32(x, w1, b1, w2, b2, gamma, beta):
    """Pure-JAX f32 reference (matches the PyTorch module in eval mode)."""
    h = jnp.maximum(jnp.einsum("bld,df->blf", x, w1) + b1, 0.0)
    y = jnp.einsum("blf,fd->bld", h, w2) + b2
    z = y + x
    mean = jnp.mean(z, axis=-1, keepdims=True)
    var = jnp.mean((z - mean) ** 2, axis=-1, keepdims=True)
    return (z - mean) / jnp.sqrt(var + 1e-5) * gamma + beta


def reference_ffn_bf16(x, w1, b1, w2, b2, gamma, beta):
    """Reference with the same bf16-operand / f32-accumulate matmuls."""
    h = jnp.einsum("bld,df->blf", x.astype(jnp.bfloat16),
                   w1.astype(jnp.bfloat16),
                   preferred_element_type=jnp.float32) + b1
    h = jnp.maximum(h, 0.0)
    y = jnp.einsum("blf,fd->bld", h.astype(jnp.bfloat16),
                   w2.astype(jnp.bfloat16),
                   preferred_element_type=jnp.float32) + b2
    z = y + x
    mean = jnp.mean(z, axis=-1, keepdims=True)
    var = jnp.mean((z - mean) ** 2, axis=-1, keepdims=True)
    return (z - mean) / jnp.sqrt(var + 1e-5) * gamma + beta


if __name__ == "__main__":
    # Small but lane-dense shapes: din is a multiple of 128 so output stores
    # are full-width vst (no masked partial stores).
    B, L, din, dout = 2, 8, 128, 256

    key = jax.random.PRNGKey(0)
    kx, k1, k2, k3, k4 = jax.random.split(key, 5)

    x = jax.random.normal(kx, (B, L, din), dtype=jnp.float32)

    # Conv1d(din, dout, 1).weight has shape (dout, din, 1); we store the
    # squeezed, transposed matmul operand directly.
    w1 = jax.random.normal(k1, (din, dout), dtype=jnp.float32) * 0.1
    b1 = jax.random.normal(k2, (dout,), dtype=jnp.float32) * 0.1
    w2 = jax.random.normal(k3, (dout, din), dtype=jnp.float32) * 0.1
    b2 = jax.random.normal(k4, (din,), dtype=jnp.float32) * 0.1
    gamma = jnp.ones((din,), dtype=jnp.float32)
    beta = jnp.zeros((din,), dtype=jnp.float32)

    # Pre-cast weights to bf16 once (the kernel's MXU operand dtype) so no
    # per-call cast traffic is added by the wrapper.
    w1_bf = w1.astype(jnp.bfloat16)
    w2_bf = w2.astype(jnp.bfloat16)

    out = positionwise_ffn(x, w1_bf, b1, w2_bf, b2, gamma, beta)
    out = jax.block_until_ready(out)
    assert out.shape == (B, L, din)

    # Tight check vs. the bf16-operand reference (same matmul precision).
    ref_bf16 = reference_ffn_bf16(x, w1, b1, w2, b2, gamma, beta)
    assert jnp.allclose(out, ref_bf16, atol=5e-3, rtol=5e-3)

    # Looser check vs. the full-f32 reference (bf16 matmul quantization).
    ref_f32 = reference_ffn_f32(x, w1, b1, w2, b2, gamma, beta)
    assert jnp.allclose(out, ref_f32, atol=5e-2, rtol=5e-2)

    print("KERNEL_OK")
</pallas_src>

<mosaic_0001>
module attributes {stable_mosaic.version = 11 : i64} {
  func.func @_ffn_kernel(%arg0: i32, %arg1: i32, %arg2: memref<8x128xf32, #tpu.memory_space<vmem>>, %arg3: memref<128x256xbf16, #tpu.memory_space<vmem>>, %arg4: memref<1x256xf32, #tpu.memory_space<vmem>>, %arg5: memref<256x128xbf16, #tpu.memory_space<vmem>>, %arg6: memref<1x128xf32, #tpu.memory_space<vmem>>, %arg7: memref<1x128xf32, #tpu.memory_space<vmem>>, %arg8: memref<1x128xf32, #tpu.memory_space<vmem>>, %arg9: memref<8x128xf32, #tpu.memory_space<vmem>>, %arg10: memref<8x128xf32, #tpu.memory_space<vmem>>) attributes {dimension_semantics = [#tpu.dimension_semantics<parallel>, #tpu.dimension_semantics<arbitrary>], iteration_bounds = array<i64: 2, 1>, scalar_prefetch = 0 : i64, scratch_operands = 1 : i64, tpu.core_type = #tpu.core_type<tc>, window_params = [{transform_indices = @transform_0, window_bounds = array<i64: 8, 128>}, {pipeline_mode = #tpu.pipeline_mode<synchronous>, transform_indices = @transform_1, window_bounds = array<i64: 128, 256>}, {pipeline_mode = #tpu.pipeline_mode<synchronous>, transform_indices = @transform_2, window_bounds = array<i64: 1, 256>}, {pipeline_mode = #tpu.pipeline_mode<synchronous>, transform_indices = @transform_3, window_bounds = array<i64: 256, 128>}, {pipeline_mode = #tpu.pipeline_mode<synchronous>, transform_indices = @transform_4, window_bounds = array<i64: 1, 128>}, {pipeline_mode = #tpu.pipeline_mode<synchronous>, transform_indices = @transform_5, window_bounds = array<i64: 1, 128>}, {pipeline_mode = #tpu.pipeline_mode<synchronous>, transform_indices = @transform_6, window_bounds = array<i64: 1, 128>}, {transform_indices = @transform_7, window_bounds = array<i64: 8, 128>}]} {
    %c0_i32 = arith.constant 0 : i32
    %0 = arith.cmpi eq, %arg1, %c0_i32 : i32
    %1 = arith.extui %0 : i1 to i32
    %c0_i32_0 = arith.constant 0 : i32
    %2 = arith.cmpi ne, %1, %c0_i32_0 : i32
    scf.if %2 {
      %cst_16 = arith.constant 0.000000e+00 : f32
      %21 = vector.broadcast %cst_16 : f32 to vector<8x128xf32>
      %c0_17 = arith.constant 0 : index
      %c0_18 = arith.constant 0 : index
      %22 = vector.load %arg10[%c0_17, %c0_18] : memref<8x128xf32, #tpu.memory_space<vmem>>, vector<8x128xf32>
      tpu.vector_store %arg10[%c0_17, %c0_18], %21 {strides = array<i32>} : memref<8x128xf32, #tpu.memory_space<vmem>>, vector<8x128xf32>,
    } else {
    }
    %c0 = arith.constant 0 : index
    %c0_1 = arith.constant 0 : index
    %3 = vector.load %arg2[%c0, %c0_1] : memref<8x128xf32, #tpu.memory_space<vmem>>, vector<8x128xf32>
    %4 = arith.truncf %3 : vector<8x128xf32> to vector<8x128xbf16>
    %c0_2 = arith.constant 0 : index
    %c0_3 = arith.constant 0 : index
    %5 = vector.load %arg3[%c0_2, %c0_3] : memref<128x256xbf16, #tpu.memory_space<vmem>>, vector<128x256xbf16>
    %cst = arith.constant dense<0.000000e+00> : vector<8x256xf32>
    %6 = tpu.matmul %4, %5, %cst {dimension_numbers = #tpu.dot_dimension_numbers<[1], [0], [0], [1], [0, 0, 1, 1], [], []>} : vector<8x128xbf16>, vector<128x256xbf16>, vector<8x256xf32> -> vector<8x256xf32>
    %c0_4 = arith.constant 0 : index
    %c0_5 = arith.constant 0 : index
    %7 = vector.load %arg4[%c0_4, %c0_5] : memref<1x256xf32, #tpu.memory_space<vmem>>, vector<1x256xf32>
    %8 = vector.broadcast %7 : vector<1x256xf32> to vector<8x256xf32>
    %9 = arith.addf %6, %8 : vector<8x256xf32>
    %cst_6 = arith.constant 0.000000e+00 : f32
    %10 = vector.broadcast %cst_6 : f32 to vector<8x256xf32>
    %11 = arith.maximumf %9, %10 : vector<8x256xf32>
    %c0_7 = arith.constant 0 : index
    %c0_8 = arith.constant 0 : index
    %12 = vector.load %arg10[%c0_7, %c0_8] : memref<8x128xf32, #tpu.memory_space<vmem>>, vector<8x128xf32>
    %13 = arith.truncf %11 : vector<8x256xf32> to vector<8x256xbf16>
    %c0_9 = arith.constant 0 : index
    %c0_10 = arith.constant 0 : index
    %14 = vector.load %arg5[%c0_9, %c0_10] : memref<256x128xbf16, #tpu.memory_space<vmem>>, vector<256x128xbf16>
    %cst_11 = arith.constant dense<0.000000e+00> : vector<8x128xf32>
    %15 = tpu.matmul %13, %14, %cst_11 {dimension_numbers = #tpu.dot_dimension_numbers<[1], [0], [0], [1], [0, 0, 1, 1], [], []>} : vector<8x256xbf16>, vector<256x128xbf16>, vector<8x128xf32> -> vector<8x128xf32>
    %16 = arith.addf %12, %15 : vector<8x128xf32>
    %c0_12 = arith.constant 0 : index
    %c0_13 = arith.constant 0 : index
    %17 = vector.load %arg10[%c0_12, %c0_13] : memref<8x128xf32, #tpu.memory_space<vmem>>, vector<8x128xf32>
    tpu.vector_store %arg10[%c0_12, %c0_13], %16 {strides = array<i32>} : memref<8x128xf32, #tpu.memory_space<vmem>>, vector<8x128xf32>,
    %c0_i32_14 = arith.constant 0 : i32
    %18 = arith.cmpi eq, %arg1, %c0_i32_14 : i32
    %19 = arith.extui %18 : i1 to i32
    %c0_i32_15 = arith.constant 0 : i32
    %20 = arith.cmpi ne, %19, %c0_i32_15 : i32
    scf.if %20 {
      %c0_16 = arith.constant 0 : index
      %c0_17 = arith.constant 0 : index
      %21 = vector.load %arg2[%c0_16, %c0_17] : memref<8x128xf32, #tpu.memory_space<vmem>>, vector<8x128xf32>
      %c0_18 = arith.constant 0 : index
      %c0_19 = arith.constant 0 : index
      %22 = vector.load %arg10[%c0_18, %c0_19] : memref<8x128xf32, #tpu.memory_space<vmem>>, vector<8x128xf32>
      %c0_20 = arith.constant 0 : index
      %c0_21 = arith.constant 0 : index
      %23 = vector.load %arg6[%c0_20, %c0_21] : memref<1x128xf32, #tpu.memory_space<vmem>>, vector<1x128xf32>
      %24 = vector.broadcast %23 : vector<1x128xf32> to vector<8x128xf32>
      %25 = arith.addf %22, %24 : vector<8x128xf32>
      %26 = arith.addf %25, %21 : vector<8x128xf32>
      %cst_22 = arith.constant dense<0.000000e+00> : vector<8xf32>
      %27 = vector.multi_reduction <add>, %26, %cst_22 [1] : vector<8x128xf32> to vector<8xf32>
      %28 = vector.shape_cast %27 : vector<8xf32> to vector<8x1xf32>
      %cst_23 = arith.constant 1.280000e+02 : f32
      %29 = vector.broadcast %cst_23 : f32 to vector<8x1xf32>
      %30 = arith.divf %28, %29 : vector<8x1xf32>
      %31 = vector.broadcast %30 : vector<8x1xf32> to vector<8x128xf32>
      %32 = arith.subf %26, %31 : vector<8x128xf32>
      %33 = arith.mulf %32, %32 : vector<8x128xf32>
      %cst_24 = arith.constant dense<0.000000e+00> : vector<8xf32>
      %34 = vector.multi_reduction <add>, %33, %cst_24 [1] : vector<8x128xf32> to vector<8xf32>
      %35 = vector.shape_cast %34 : vector<8xf32> to vector<8x1xf32>
      %cst_25 = arith.constant 1.280000e+02 : f32
      %36 = vector.broadcast %cst_25 : f32 to vector<8x1xf32>
      %37 = arith.divf %35, %36 : vector<8x1xf32>
      %cst_26 = arith.constant 9.99999974E-6 : f32
      %38 = vector.broadcast %cst_26 : f32 to vector<8x1xf32>
      %39 = arith.addf %37, %38 : vector<8x1xf32>
      %40 = math.rsqrt %39 : vector<8x1xf32>
      %41 = vector.broadcast %40 : vector<8x1xf32> to vector<8x128xf32>
      %42 = arith.mulf %32, %41 : vector<8x128xf32>
      %c0_27 = arith.constant 0 : index
      %c0_28 = arith.constant 0 : index
      %43 = vector.load %arg7[%c0_27, %c0_28] : memref<1x128xf32, #tpu.memory_space<vmem>>, vector<1x128xf32>
      %44 = vector.broadcast %43 : vector<1x128xf32> to vector<8x128xf32>
      %45 = arith.mulf %42, %44 : vector<8x128xf32>
      %c0_29 = arith.constant 0 : index
      %c0_30 = arith.constant 0 : index
      %46 = vector.load %arg8[%c0_29, %c0_30] : memref<1x128xf32, #tpu.memory_space<vmem>>, vector<1x128xf32>
      %47 = vector.broadcast %46 : vector<1x128xf32> to vector<8x128xf32>
      %48 = arith.addf %45, %47 : vector<8x128xf32>
      %c0_31 = arith.constant 0 : index
      %c0_32 = arith.constant 0 : index
      %49 = vector.load %arg9[%c0_31, %c0_32] : memref<8x128xf32, #tpu.memory_space<vmem>>, vector<8x128xf32>
      tpu.vector_store %arg9[%c0_31, %c0_32], %48 {strides = array<i32>} : memref<8x128xf32, #tpu.memory_space<vmem>>, vector<8x128xf32>,
    } else {
    }
    return
  }
  func.func @transform_0(%arg0: i32, %arg1: i32) -> (i32, i32) {
    %c0_i32 = arith.constant 0 : i32
    %c0_i32_0 = arith.constant 0 : i32
    return %arg0, %c0_i32 : i32, i32
  }
  func.func @transform_1(%arg0: i32, %arg1: i32) -> (i32, i32) {
    %c0_i32 = arith.constant 0 : i32
    %c0_i32_0 = arith.constant 0 : i32
    return %c0_i32, %arg1 : i32, i32
  }
  func.func @transform_2(%arg0: i32, %arg1: i32) -> (i32, i32) {
    %c0_i32 = arith.constant 0 : i32
    %c0_i32_0 = arith.constant 0 : i32
    return %c0_i32, %arg1 : i32, i32
  }
  func.func @transform_3(%arg0: i32, %arg1: i32) -> (i32, i32) {
    %c0_i32 = arith.constant 0 : i32
    %c0_i32_0 = arith.constant 0 : i32
    return %arg1, %c0_i32 : i32, i32
  }
  func.func @transform_4(%arg0: i32, %arg1: i32) -> (i32, i32) {
    %c0_i32 = arith.constant 0 : i32
    %c0_i32_0 = arith.constant 0 : i32
    %c0_i32_1 = arith.constant 0 : i32
    return %c0_i32, %c0_i32_0 : i32, i32
  }
  func.func @transform_5(%arg0: i32, %arg1: i32) -> (i32, i32) {
    %c0_i32 = arith.constant 0 : i32
    %c0_i32_0 = arith.constant 0 : i32
    %c0_i32_1 = arith.constant 0 : i32
    return %c0_i32, %c0_i32_0 : i32, i32
  }
  func.func @transform_6(%arg0: i32, %arg1: i32) -> (i32, i32) {
    %c0_i32 = arith.constant 0 : i32
    %c0_i32_0 = arith.constant 0 : i32
    %c0_i32_1 = arith.constant 0 : i32
    return %c0_i32, %c0_i32_0 : i32, i32
  }
  func.func @transform_7(%arg0: i32, %arg1: i32) -> (i32, i32) {
    %c0_i32 = arith.constant 0 : i32
    %c0_i32_0 = arith.constant 0 : i32
    return %arg0, %c0_i32 : i32, i32
  }
}

</mosaic_0001>

<bundles_post_ra>
// kernel: tpu_custom_call.1
= control target key start
LH: loop header
LB: loop body
LE: loop exit
PB: predicated region body
PF: predicated region fallthrough
CT: control target
= control target key end

     0   :  { %s1583_s0 = inlined_call_operand.hbm [shape: f32[16,128], index: 0, kind: input, shape index: {}]   ;;  %s1584_s1 = inlined_call_operand.hbm [shape: bf16[128,256], index: 1, kind: input, shape index: {}]   ;;  %s1585_s2 = inlined_call_operand.hbm [shape: f32[1,256], index: 2, kind: input, shape index: {}]   ;;  %s1586_s3 = inlined_call_operand.hbm [shape: bf16[256,128], index: 3, kind: input, shape index: {}]   ;;  %s1587_s4 = inlined_call_operand.vmem [shape: f32[1,128], index: 4, kind: input, shape index: {}]   ;;  %s1588_s5 = inlined_call_operand.vmem [shape: f32[1,128], index: 5, kind: input, shape index: {}]   ;;  %s1589_s6 = inlined_call_operand.vmem [shape: f32[1,128], index: 6, kind: input, shape index: {}]   ;;  %s1590_s7 = inlined_call_operand.hbm [shape: f32[16,128], index: 7, kind: output, shape index: {}]  }
   0x1   :  { %1591 = sst [smem:[#allocation16_spill]] %s1584_s1 }
   0x2   :  { %1592 = sst [smem:[#allocation17_spill]] %s1585_s2 }
   0x3   :  { %12 = vsyncpa [#allocation4], 0 }
   0x4   :  { %14 = vsyncpa [#allocation4 + $0x1], 0 }
   0x5   :  { %15 = vsyncpa [#allocation7], 0 }
   0x6   :  { %16 = vsyncpa [#allocation10], 0 }
   0x7   :  { %17 = vsyncpa [#allocation5], 0 }
   0x8   :  { %19 = vsyncpa [#allocation5 + $0x1], 0  ;;  %s1400_s24 = smov 0   ;;  %s1402_s25 = smov 0  }
   0x9   :  { %s1404_s26 = smov 0   ;;  %s1406_s27 = smov 0  }
   0xa   :  { %s1408_s28 = smov 0   ;;  %s1410_s29 = smov 0  }
   0xb LB: > { %s856_s30 = sadd.s32 4294967295, %s1350_s29   ;;  %p858_p0 = scmp.ge.s32.totalorder %s1350_s29, 1  ;;  %s1350_s29 = sphi %s1410_s29, %s25_s29   ;;  %s1346_s28 = sphi %s1408_s28, %s1606_s28   ;;  %s1342_s27 = sphi %s1406_s27, %s1605_s27   ;;  %s1338_s26 = sphi %s1404_s26, %s1604_s26   ;;  %s1334_s25 = sphi %s1402_s25, %s1603_s25   ;;  %s1330_s24 = sphi %s1400_s24, %s1602_s24  }
   0xc   : > { %p1434_p1 = scmp.eq.s32.totalorder %s856_s30, 0  ;;  %p235_p2 = scmp.lt.s32.totalorder %s1350_s29, 3 }
   0xd   : > { %s1594_s1 = sld [smem:[#allocation16_spill]]  ;;  %s1352_s13 = smov [#allocation6]  }
   0xe   : > { %p1442_p3 = pnand %p858_p0, %p235_p2  ;;  %s251_s14 = sshll.u32 %s1352_s13, 4  ;;  %s252_s14 = int_to_ptr.vmem [resolvable:$true] %s251_s14 }
   0xf   : > { %p862_p6 = scmp.ge.s32.totalorder %s1350_s29, 2  ;;  %s1597_s2 = sld [smem:[#allocation17_spill]] }
  0x10   : > { %p1051_p4 = pneg %p1442_p3  ;;  %s1353_s19 = smov 128  }
  0x11   : > { %s1354_s20 = smov 8   ;;  %s1355_s21 = smov [#allocation8]  }
  0x12   : > { %p1450_p5 = pnand %p1051_p4, %p1434_p1  ;;  %s268_s22 = sshll.u32 %s1355_s21, 4  ;;  %s269_s22 = int_to_ptr.vmem [resolvable:$true] %s268_s22 }
  0x13   : > { %s249_s11 = sshll.u32 %s1594_s1, 4  ;;  %s280_s10 = sshll.u32 %s1586_s3, 4  ;;  %s250_s11 = int_to_ptr.hbm [resolvable:$true] %s249_s11  ;;  %s281_s10 = int_to_ptr.hbm [resolvable:$true] %s280_s10 }
  0x14   : > { %1054 = dma.hbm_to_vmem [thread:$0]  (!%p1450_p5), %s250_s11, 2048, %s252_s14, [#allocation7], %s1353_s19, %s1353_s19, %s1354_s20  }
  0x15   : > { %s266_s18 = sshll.u32 %s1597_s2, 4  ;;  %s1356_s13 = smov [#allocation9]   ;;  %s267_s18 = int_to_ptr.hbm [resolvable:$true] %s266_s18 }
  0x16   : > { %1057 = dma.hbm_to_vmem [thread:$0]  (!%p1450_p5), %s267_s18, 32, %s269_s22, [#allocation7]  }
  0x17   : > { %s282_s16 = sshll.u32 %s1356_s13, 4  ;;  %s1357_s11 = smov 64   ;;  %s283_s16 = int_to_ptr.vmem [resolvable:$true] %s282_s16 }
  0x18   : > { %s1358_s14 = smov 4   ;;  %s857_s17 = sadd.s32 4294967294, %s1350_s29  }
  0x19   : > { %1060 = dma.hbm_to_vmem [thread:$0]  (!%p1450_p5), %s281_s10, 2048, %s283_s16, [#allocation10], %s1357_s11, %s1357_s11, %s1358_s14  }
  0x1a   : > { %s37_s19 = sadd.s32 1, %s1346_s28  ;;  %s44_s20 = sadd.s32 1, %s1338_s26 }
  0x1b   : > { %p39_p7 = scmp.ge.s32.totalorder %s37_s19, 2  ;;  %p51_p8 = scmp.ne.s32.totalorder %s1338_s26, %s1334_s25 }
  0x1c   : > { %p52_p9 = scmp.eq.s32.totalorder %s1350_s29, 0  ;;  %p57_p10 = scmp.ne.s32.totalorder %s1334_s25, %s1330_s24 }
  0x1d   : > { %s1608_s19 = smov (%p39_p7, %s37_s19), 0  ;;  %p222_p13 = scmp.eq.s32.totalorder %s856_s30, 1 }
  0x1e   : > { %p1477_p11 = por %p52_p9, %p51_p8  ;;  %p1483_p12 = por %p1434_p1, %p57_p10 }
  0x1f   : > { %s41_s21 = ssub.s32 %s1346_s28, %s1608_s19  ;;  %p228_p2 = scmp.eq.s32.totalorder %s857_s17, 1 }
  0x20   : > { %p42_p0 = scmp.eq.s32.totalorder %s41_s21, 0  ;;  %p1491_p4 = por %p222_p13, %p51_p8 }
  0x21   : > { %p1072_p5 = scmp.lt.s32.totalorder %s1350_s29, 2  ;;  %p1499_p7 = por %p228_p2, %p57_p10 }
  0x22   : > { %s1497_s23 = scalar_select %p42_p0, %s1338_s26, %s44_s20  }
  0x23   : > { %s305_s10 = sand.u32 1, %s1338_s26   ;;  %s864_s16 = sshll.u32 %s1346_s28, 3 }
  0x24   : > { %s863_s13 = sshll.u32 %s305_s10, 3  ;;  %s313_s30 = scalar_lea.hbm %s1583_s0, %s864_s16 }
  0x25   : > { %s309_s21 = scalar_lea.vmem [#allocation3], %s863_s13  ;;  %s315_s1 = sshll.u32 %s313_s30, 4  ;;  %s316_s1 = int_to_ptr.hbm [resolvable:$true] %s315_s1 }
  0x26   : > { %s317_s17 = sshll.u32 %s309_s21, 4  ;;  %p1062_p8 = pnand %p1072_p5, %p1477_p11  ;;  %s318_s17 = int_to_ptr.vmem [resolvable:$true] %s317_s17 }
  0x27   : > { %s306_s20 = scalar_lea.sflag [#allocation4], %s305_s10  ;;  %326 = sbr.rel (%p1442_p3) target bundleno = 623 (0x26f), region = 48 }
  0x28   : > { %1064 = dma.hbm_to_vmem [thread:$0]  (!%p1062_p8), %s316_s1, 128, %s318_s17, %s306_s20  }
  0x29   : > { %s1513_s2 = sand.u32 (!%p1442_p3), 1, %s1334_s25  }
  0x2a   : > { %s866_s16 = sshll.u32 (!%p1442_p3), %s1513_s2, 3  ;;  %s329_s13 = scalar_lea.sflag (!%p1442_p3), [#allocation4], %s1513_s2 }
  0x2b   : > { %s1519_s11 = scalar_lea.vmem (!%p1442_p3), [#allocation3], %s866_s16 }
  0x2c   : > { %1313 = dma.done.wait (%p1483_p12), %s329_s13, 128  }
  0x2d   : > { %1315 = vsyncadd (%p1483_p12), %s329_s13, 4294967168 }
  0x2e   : > { %1317 = dma.done.wait (%p1434_p1), [#allocation7], 2080  }
  0x2f   : > { %1319 = vsyncadd (%p1434_p1), [#allocation7], 4294965216 }
  0x30   : > { %1321 = dma.done.wait (%p1434_p1), [#allocation10], 2048  }
  0x31   : > { %1323 = vsyncadd (%p1434_p1), [#allocation10], 4294965248  ;;  %v929_v0 = vld [vmem:[#allocation6 + $0x70] sm:$0xf]  ;;  %v1018_v1 = vld [vmem:[#allocation6 + $0x74] sm:$0xf0] }
  0x32   : > { %v1017_v2 = vld [vmem:[#allocation6 + $0x74] sm:$0xf]  ;;  %v930_v3 = vor.u32 %v1018_v1, %v929_v0  ;;  %v931_v4 = vld [vmem:[#allocation6 + $0x78] sm:$0xf0]  ;;  %v921_v5 = vld [vmem:[#allocation6 + $0x60] sm:$0xf] }
  0x33   : > { %v1016_v6 = vld [vmem:[#allocation6 + $0x64] sm:$0xf0]  ;;  %v934_v7 = vor.u32 %v1017_v2, %v931_v4  ;;  %v1015_v8 = vld [vmem:[#allocation6 + $0x64] sm:$0xf]  ;;  %v923_v9 = vld [vmem:[#allocation6 + $0x68] sm:$0xf0] }
  0x34   : > { %491 = vmatpush.bf16.msra.mxu0 %v930_v3  ;;  %v922_v10 = vor.u32 %v1016_v6, %v921_v5  ;;  %v926_v11 = vor.u32 %v1015_v8, %v923_v9  ;;  %v913_v12 = vld [vmem:[#allocation6 + $0x50] sm:$0xf]  ;;  %v1014_v13 = vld [vmem:[#allocation6 + $0x54] sm:$0xf0]  ;;  %v1013_v14 = vld [vmem:[#allocation6 + $0x54] sm:$0xf] }
  0x35   : > { %504 = vmatpush.bf16.msra.mxu1 %v934_v7  ;;  %v915_v15 = vld [vmem:[#allocation6 + $0x58] sm:$0xf0]  ;;  %v914_v16 = vor.u32 %v1014_v13, %v913_v12  ;;  %v905_v18 = vld [vmem:[#allocation6 + $0x40] sm:$0xf]  ;;  %v1012_v19 = vld [vmem:[#allocation6 + $0x44] sm:$0xf0] }
  0x36   : > { %v918_v17 = vor.u32 %v1013_v14, %v915_v15  ;;  %v1011_v20 = vld [vmem:[#allocation6 + $0x44] sm:$0xf]  ;;  %v907_v21 = vld [vmem:[#allocation6 + $0x48] sm:$0xf0]  ;;  %v906_v22 = vor.u32 %v1012_v19, %v905_v18  ;;  %v1026_v23 = vld [vmem:[#allocation9 + $0x38] sm:$0xff]  ;;  %s1000_s12 = sshll.u32 %s1342_s27, 3 }
  0x37   : > { %v1034_v24 = vld [vmem:[#allocation9 + $0x78] sm:$0xff]  ;;  %v910_v25 = vor.u32 %v1011_v20, %v907_v21  ;;  %v897_v26 = vld [vmem:[#allocation6 + $0x30] sm:$0xf]  ;;  %v1009_v28 = vld [vmem:[#allocation6 + $0x34] sm:$0xf]  ;;  %650 = vmatpush.bf16.msra.mxu2 %v1026_v23  ;;  %v1359_v23 = vmov 128.0   ;;  %s738_s30 = scalar_lea.hbm %s1590_s7, %s1000_s12 }
  0x38   : > { %492 = vmatpush.bf16.msra.mxu0 %v922_v10  ;;  %v1010_v27 = vld [vmem:[#allocation6 + $0x34] sm:$0xf0]  ;;  %v899_v29 = vld [vmem:[#allocation6 + $0x38] sm:$0xf0]  ;;  %663 = vmatpush.bf16.msra.mxu3 %v1034_v24  ;;  %v889_v33 = vld [vmem:[#allocation6 + $0x20] sm:$0xf]  ;;  %1136 = vrcp.f32 %v1359_v23 }
  0x39   : > { %505 = vmatpush.bf16.msra.mxu1 %v926_v11  ;;  %v1025_v30 = vld [vmem:[#allocation9 + $0x30] sm:$0xff]  ;;  %v898_v32 = vor.u32 %v1010_v27, %v897_v26  ;;  %v902_v34 = vor.u32 %v1009_v28, %v899_v29  ;;  %v1008_v35 = vld [vmem:[#allocation6 + $0x24] sm:$0xf0]  ;;  %v1007_v36 = vld [vmem:[#allocation6 + $0x24] sm:$0xf]  ;;  %s378_s27 = scalar_lea.vmem [#allocation11], %s866_s16 }
  0x3a   : > { %v1033_v31 = vld [vmem:[#allocation9 + $0x70] sm:$0xff]  ;;  %v891_v37 = vld [vmem:[#allocation6 + $0x28] sm:$0xf0]  ;;  %v890_v40 = vor.u32 %v1008_v35, %v889_v33  ;;  %v883_v45 = vld [vmem:[#allocation6 + $0x18] sm:$0xf0]  ;;  %s740_s20 = sshll.u32 %s378_s27, 4  ;;  %s741_s20 = int_to_ptr.vmem [resolvable:$true] %s740_s20 }
  0x3b   : > { %651 = vmatpush.bf16.msra.mxu2 %v1025_v30  ;;  %v1024_v38 = vld [vmem:[#allocation9 + $0x28] sm:$0xff]  ;;  %v894_v41 = vor.u32 %v1007_v36, %v891_v37  ;;  %v1006_v43 = vld [vmem:[#allocation6 + $0x14] sm:$0xf0]  ;;  %v1005_v44 = vld [vmem:[#allocation6 + $0x14] sm:$0xf]  ;;  %s742_s13 = sshll.u32 %s738_s30, 4  ;;  %s743_s13 = int_to_ptr.hbm [resolvable:$true] %s742_s13 }
  0x3c   : > { %493 = vmatpush.bf16.msra.mxu0 %v914_v16  ;;  %664 = vmatpush.bf16.msra.mxu3 %v1033_v31  ;;  %v1032_v39 = vld [vmem:[#allocation9 + $0x68] sm:$0xff]  ;;  %v1023_v46 = vld [vmem:[#allocation9 + $0x20] sm:$0xff]  ;;  %v886_v49 = vor.u32 %v1005_v44, %v883_v45  ;;  %v1022_v54 = vld [vmem:[#allocation9 + $0x18] sm:$0xff]  ;;  %s1274_s1 = sshra.s32 %s743_s13, 4  ;;  %s1280_s15 = scalar_lea.hbm %s1590_s7, 16  ;;  %s1275_s1 = int_to_ptr.hbm [resolvable:$true] %s1274_s1 }
  0x3d   : > { %506 = vmatpush.bf16.msra.mxu1 %v918_v17  ;;  %v881_v42 = vld [vmem:[#allocation6 + $0x10] sm:$0xf]  ;;  %v1031_v47 = vld [vmem:[#allocation9 + $0x60] sm:$0xff]  ;;  %v875_v53 = vld [vmem:[#allocation6 + $0x8] sm:$0xf0]  ;;  %s1276_s8 = scalar_lea.hbm %s1275_s1, 8  ;;  %p1281_p10 = scmp.lt.s32.totalorder %s1275_s1, %s1590_s7 }
  0x3e   : > { %v882_v48 = vor.u32 %v1006_v43, %v881_v42  ;;  %v873_v50 = vld [vmem:[#allocation6] sm:$0xf]  ;;  %v1004_v51 = vld [vmem:[#allocation6 + $0x4] sm:$0xf0]  ;;  %v1003_v52 = vld [vmem:[#allocation6 + $0x4] sm:$0xf]  ;;  %v1137_v24 = vpop.eup %1136  ;;  %p1277_p1 = scmp.ne.s32.totalorder %s1275_s1, %s1276_s8  ;;  %p1282_p11 = scmp.lt.s32.totalorder %s1280_s15, %s1276_s8 }
  0x3f   : > { %652 = vmatpush.bf16.msra.mxu2 %v1024_v38  ;;  %v1030_v55 = vld [vmem:[#allocation9 + $0x58] sm:$0xff]  ;;  %v874_v56 = vor.u32 %v1004_v51, %v873_v50  ;;  %v878_v58 = vor.u32 %v1003_v52, %v875_v53  ;;  %v1021_v59 = vld [vmem:[#allocation9 + $0x10] sm:$0xff]  ;;  %v1020_v62 = vld [vmem:[#allocation9 + $0x8] sm:$0xff]  ;;  %vm696_vm0 = vweird.f32 %v1137_v24 }
  0x40   : > { %494 = vmatpush.bf16.msra.mxu0 %v906_v22  ;;  %665 = vmatpush.bf16.msra.mxu3 %v1032_v39  ;;  %v387_v57 = vld [vmem:[%s1519_s11] sm:$0xff]  ;;  %v1019_v0 = vld [vmem:[#allocation9] sm:$0xff]  ;;  %v405_v2 = vld [vmem:[#allocation8] sm:$0x3]  ;;  %s728_s11 = scalar_lea.sflag [#allocation5], %s1513_s2  ;;  %p1278_p3 = pnand %p1277_p1, %p1491_p4 }
  0x41   : > { %507 = vmatpush.bf16.msra.mxu1 %v910_v25  ;;  %v1029_v60 = vld [vmem:[#allocation9 + $0x50] sm:$0xff]  ;;  %v388_v61 = vpack.c.bf16 %v387_v57, %v387_v57  ;;  %v1028_v63 = vld [vmem:[#allocation9 + $0x48] sm:$0xff]  ;;  %v1027_v1 = vld [vmem:[#allocation9 + $0x40] sm:$0xff]  ;;  %v407_v3 = vperm.slane %v405_v2, 0  ;;  %v408_v4 = vperm.slane %v405_v2, 1  ;;  %v692_v25 = vmul.f32 128.0, %v1137_v24  ;;  %p1283_p12 = por %p1282_p11, %p1281_p10 }
  0x42   : > { %v1133_v16 = vld [vmem:[%s1587_s4] ss:$0 sm:$0xff]  ;;  %p1279_p9 = pneg %p1278_p3 }
  0x43   : > { %653 = vmatpush.bf16.msra.mxu2 %v1023_v46  ;;  %v693_v26 = vsub.f32 1.0, %v692_v25  ;;  %v1134_v43 = vld [vmem:[%s1588_s5] ss:$0 sm:$0xff] }
  0x44   : > { %495 = vmatpush.bf16.msra.mxu0 %v898_v32  ;;  %666 = vmatpush.bf16.msra.mxu3 %v1031_v47  ;;  %v1135_v46 = vld [vmem:[%s1589_s6] ss:$0 sm:$0xff]  ;;  %p1284_p13 = pnand %p1283_p12, %p1279_p9 }
  0x45   : > { %508 = vmatpush.bf16.msra.mxu1 %v902_v34  ;;  %v694_v27 = vmul.f32 %v1137_v24, %v693_v26 }
  0x47   : > { %654 = vmatpush.bf16.msra.mxu2 %v1022_v54  ;;  %v695_v28 = vadd.f32 %v1137_v24, %v694_v27 }
  0x48   : > { %496 = vmatpush.bf16.msra.mxu0 %v890_v40  ;;  %667 = vmatpush.bf16.msra.mxu3 %v1030_v55 }
  0x49   : > { %509 = vmatpush.bf16.msra.mxu1 %v894_v41  ;;  %v697_v29 = vsel %vm696_vm0, %v1137_v24, %v695_v28 }
  0x4b   : > { %655 = vmatpush.bf16.msra.mxu2 %v1021_v59 }
  0x4c   : > { %497 = vmatpush.bf16.msra.mxu0 %v882_v48  ;;  %668 = vmatpush.bf16.msra.mxu3 %v1029_v60 }
  0x4d   : > { %510 = vmatpush.bf16.msra.mxu1 %v886_v49 }
  0x4f   : > { %656 = vmatpush.bf16.msra.mxu2 %v1020_v62 }
  0x50   : > { %498 = vmatpush.bf16.msra.mxu0 %v874_v56  ;;  %669 = vmatpush.bf16.msra.mxu3 %v1028_v63 }
  0x51   : > { %511 = vmatpush.bf16.msra.mxu1 %v878_v58 }
  0x53   : > { %499 = vmatmul.bf16.vlgmr.msra.gmra.mxu0 %v388_v61  ;;  %657 = vmatpush.bf16.msra.mxu2 %v1019_v0 }
  0x54   : > { %512 = vmatmul.bf16.vlgmr.msra.gmra.mxu1 %v388_v61  ;;  %670 = vmatpush.bf16.msra.mxu3 %v1027_v1 }
  0xd0   : > { %v500_v5 = vpop.f32.mrf.mxu0 }
  0xd1   : > { %v501_v6 = vadd.f32 %v500_v5, %v407_v3  ;;  %v513_v7 = vpop.f32.mrf.mxu1 }
  0xd2   : > { %v514_v8 = vadd.f32 %v513_v7, %v408_v4 }
  0xd3   : > { %v517_v9 = vmax.f32 %v501_v6, 0.0 }
  0xd4   : > { %v518_v10 = vmax.f32 %v514_v8, 0.0 }
  0xd5   : > { %v520_v11 = vpack.c.bf16 %v517_v9, %v517_v9 }
  0xd6   : > { %v521_v12 = vpack.c.bf16 %v518_v10, %v518_v10 }
  0xd7   : > { %658 = vmatmul.bf16.vlgmr.msra.gmra.mxu2 %v520_v11 }
  0xd8   : > { %671 = vmatmul.bf16.vlgmr.msra.gmra.mxu3 %v521_v12  ;;  %v502_v13 = vpop.f32.mrf.mxu0 }
  0xd9   : > { %v515_v14 = vpop.f32.mrf.mxu1 }
 0x15a   : > { %v659_v15 = vpop.f32.mrf.mxu2 }
 0x15b   : > { %v672_v17 = vpop.f32.mrf.mxu3 }
 0x15c   : > { %v673_v18 = vadd.f32 %v672_v17, %v659_v15 }
 0x15e   : > { %v687_v19 = vadd.f32 %v1133_v16, %v673_v18 }
 0x160   : > { %v688_v20 = vadd.f32 %v687_v19, %v387_v57 }
 0x162   : > { %689 = vadd.xlane.f32.xlu0 %v688_v20  ;;  %v661_v21 = vpop.f32.mrf.mxu2 }
 0x163   : > { %v674_v22 = vpop.f32.mrf.mxu3 }
 0x1d5   : > { %v690_v30 = vpop.xlane.xlu0 %689 }
 0x1d6   : > { %v698_v31 = vmul.f32 %v697_v29, %v690_v30 }
 0x1d8   : > { %v699_v32 = vsub.f32 %v688_v20, %v698_v31 }
 0x1da   : > { %v700_v33 = vmul.f32 %v699_v32, %v699_v32 }
 0x1dc   : > { %701 = vadd.xlane.f32.xlu0 %v700_v33 }
 0x24f   : > { %v702_v34 = vpop.xlane.xlu0 %701 }
 0x250   : > { %v703_v35 = vmul.f32 %v702_v34, %v697_v29 }
 0x252   : > { %v704_v36 = vadd.f32 1e-05, %v703_v35 }
 0x254   : > { %1138 = vrsqrt.f32 %v704_v36  ;;  %vm711_vm2 = vweird.f32 %v704_v36 }
 0x25a   : > { %v1139_v37 = vpop.eup %1138 }
 0x25b   : > { %v706_v38 = vmul.f32 %v1139_v37, %v704_v36  ;;  %vm712_vm1 = vweird.f32 %v1139_v37 }
 0x25c   : > { %vm713_vm3 = vmor %vm711_vm2, %vm712_vm1 }
 0x25d   : > { %v707_v39 = vmul.f32 %v1139_v37, %v706_v38 }
 0x25f   : > { %v708_v40 = vmul.f32 0.5, %v707_v39 }
 0x261   : > { %v709_v41 = vsub.f32 1.5, %v708_v40 }
 0x263   : > { %v710_v42 = vmul.f32 %v1139_v37, %v709_v41 }
 0x265   : > { %v714_v44 = vsel %vm713_vm3, %v1139_v37, %v710_v42 }
 0x266   : > { %v715_v45 = vmul.f32 %v714_v44, %v699_v32 }
 0x268   : > { %v720_v47 = vmul.f32 %v1134_v43, %v715_v45 }
 0x26a   : > { %v725_v48 = vadd.f32 %v1135_v46, %v720_v47 }
 0x26c   : > { %726 = vst [vmem:[%s378_s27] sm:$0xff] %v725_v48 }
 0x26d   : > { %1287 = shalt.err (!%p1284_p13)
}
 0x26e   : > { %1049 = dma.vmem_to_hbm [thread:$0]  (%p1491_p4), %s741_s20, 128, %s743_s13, %s728_s11  }
 0x26f PF: > { %s754_s2 = sand.u32 1, %s1330_s24   ;;  %p1066_p0 = pnand %p862_p6, %p1499_p7 }
 0x270   : > { %s755_s14 = scalar_lea.sflag [#allocation5], %s754_s2 }
 0x271   : > { %p1067_p2 = pneg %p1066_p0 }
 0x273   : > { %1325 = dma.done.wait (%p1067_p2), %s755_s14, 128  }
 0x274   : > { %1327 = vsyncadd (%p1067_p2), %s755_s14, 4294967168  ;;  %s25_s29 = sadd.s32 1, %s1350_s29   ;;  %s1602_s24 = smov %s1334_s25 }
 0x275   : > { %p22_p5 = scmp.ge.s32.totalorder %s25_s29, 4   ;;  %s1603_s25 = smov %s1338_s26 }
 0x276   : > { %s1604_s26 = smov %s1497_s23  ;;  %s1605_s27 = smov %s1346_s28 }
 0x277   : > { %s1606_s28 = smov %s1608_s19  ;;  %24 = sbr.rel (!%p22_p5) target bundleno = 11 (0xb), region = 116 }
 0x27c   :  { %761 = vsyncpa [#allocation4], 1 }
 0x27d   :  { %763 = vsyncpa [#allocation4 + $0x1], 1 }
 0x27e   :  { %764 = vsyncpa [#allocation7], 1 }
 0x27f   :  { %765 = vsyncpa [#allocation10], 1 }
 0x280   :  { %766 = vsyncpa [#allocation5], 1 }
 0x281   :  { %768 = vsyncpa [#allocation5 + $0x1], 1 }

</bundles_post_ra>
